<compile_context>
chip_gen: v7x
topology: tpu7x:2x2x1
jax: 0.10.0
libtpu: 0.0.40
codegen_flags: <defaults>
</compile_context>

<pallas_src>
import functools

import jax
import jax.numpy as jnp
from jax import lax
from jax.experimental import pallas as pl
from jax.experimental.pallas import tpu as pltpu


def _conv_kernel(p_ref, w_ref, out_ref, stats_ref):
    """One (batch, pixel-tile) step: a single MXU matmul + per-tile BN partial sums.

    p_ref     : (1, Kd, TW)     bf16  im2col patches (Kd = K*Cin on sublanes, pixels on lanes)
    w_ref     : (Cout, Kd)      bf16  flattened conv weights (resident across the grid)
    out_ref   : (1, Cout, TW)   bf16  conv output, lane-dense NCHW-flat
    stats_ref : (1, 1, Cout, 2) f32   per-tile channel [sum, sum_of_squares] from the f32 acc
    """
    acc = lax.dot_general(
        w_ref[...], p_ref[0],
        dimension_numbers=(((1,), (0,)), ((), ())),
        preferred_element_type=jnp.float32)              # (Cout, TW), f32 accumulate on MXU
    out_ref[0] = acc.astype(out_ref.dtype)               # bf16 store, full-128-lane vst

    # BN batch-stat partial sums taken from the f32 accumulator (not the bf16 store).
    s = jnp.sum(acc, axis=1, keepdims=True)              # (Cout, 1)
    sq = jnp.sum(acc * acc, axis=1, keepdims=True)       # (Cout, 1)
    stats_ref[0, 0] = jnp.concatenate([s, sq], axis=1)   # (Cout, 2)


def _bn_relu_kernel(y_ref, scale_ref, bias_ref, o_ref):
    """Fused BN-affine + ReLU over a fat lane-dense (Cout, TWe) tile (bf16 in, f32 out)."""
    y = y_ref[0].astype(jnp.float32)
    o_ref[0] = jnp.maximum(y * scale_ref[...] + bias_ref[...], 0.0)


def _pick_pixel_tile(hw, n_batch, *, cap, min_steps):
    """Largest multiple-of-128 divisor of HW (<= cap); shrink while the grid would have
    fewer than `min_steps` iterations so both v7x TensorCores stay fed at tiny N."""
    cands = [t for t in range(128, min(hw, cap) + 1, 128) if hw % t == 0]
    if not cands:
        return hw           # full-extent block (allowed; only hit when HW has no 128 divisor)
    tw = cands[-1]
    while n_batch * (hw // tw) < min_steps and len(cands) > 1:
        cands.pop()
        tw = cands[-1]
    return tw


def conv_bnr(x_nchw, weight_oihw, gamma, beta, *, dilation=1, eps=1e-5,
             conv_tile=None, epilogue_tile=None):
    """Forward pass of ConvBNR. Input/output in PyTorch NCHW layout (float32)."""
    N, Cin, H, W = x_nchw.shape
    Cout, Cin_w, KH, KW = weight_oihw.shape
    assert Cin_w == Cin
    pad = dilation
    K = KH * KW
    Kd = K * Cin
    HW = H * W

    # ---- XLA-side glue: zero-pad + one-time im2col pack (cheap at small K*Cin).
    # Contraction dim goes on sublanes, pixels on lanes -> lane-dense DMA/loads,
    # and the conv kernel needs no in-kernel slicing/concat/reshape at all. ----
    xp = jnp.pad(x_nchw.astype(jnp.float32),
                 ((0, 0), (0, 0), (pad, pad), (pad, pad)))
    taps = [lax.slice(xp, (0, 0, kh * dilation, kw * dilation),
                      (N, Cin, kh * dilation + H, kw * dilation + W))
            for kh in range(KH) for kw in range(KW)]
    patches = jnp.stack(taps, axis=1).reshape(N, Kd, HW).astype(jnp.bfloat16)
    # OIHW -> (Cout, KH*KW*Cin), tap-major / channel-minor (matches the patch packing).
    w2 = jnp.transpose(weight_oihw.astype(jnp.float32), (0, 2, 3, 1))
    w2 = w2.reshape(Cout, Kd).astype(jnp.bfloat16)

    if conv_tile is None:
        # cap=2048 is conservative for v5e/v7x; on v6e this can be raised toward 8192.
        conv_tile = _pick_pixel_tile(HW, N, cap=2048, min_steps=4)
    assert HW % conv_tile == 0
    n_t = HW // conv_tile

    # ---- Pallas kernel 1: conv as one MXU matmul per tile + per-tile BN sums ----
    conv_call = pl.pallas_call(
        _conv_kernel,
        grid_spec=pltpu.PrefetchScalarGridSpec(
            num_scalar_prefetch=0,
            grid=(N, n_t),
            in_specs=[
                pl.BlockSpec((1, Kd, conv_tile), lambda n, t: (n, 0, t)),
                pl.BlockSpec((Cout, Kd), lambda n, t: (0, 0)),
            ],
            out_specs=[
                pl.BlockSpec((1, Cout, conv_tile), lambda n, t: (n, 0, t)),
                pl.BlockSpec((1, 1, Cout, 2), lambda n, t: (n, t, 0, 0)),
            ],
        ),
        out_shape=(
            jax.ShapeDtypeStruct((N, Cout, HW), jnp.bfloat16),   # bf16 intermediate
            jax.ShapeDtypeStruct((N, n_t, Cout, 2), jnp.float32),
        ),
        compiler_params=pltpu.CompilerParams(
            dimension_semantics=("parallel", "parallel"),
            vmem_limit_bytes=48 * 1024 * 1024),
    )
    conv_out, stats = conv_call(patches, w2)

    # ---- Finalize training-mode BN batch statistics (biased variance, as PyTorch) ----
    # NOTE: E[x^2]-E[x]^2 from f32 per-tile sums; adequate at conv-output magnitudes.
    # TODO(synk): BatchNorm2d running_mean/running_var momentum update (training-time
    # side effect) is not emitted; it does not affect the forward output.
    count = float(N * HW)
    tot = jnp.sum(stats, axis=(0, 1))                    # (Cout, 2)
    mean = tot[:, 0] / count
    var = jnp.maximum(tot[:, 1] / count - mean * mean, 0.0)
    scale = gamma.astype(jnp.float32) * lax.rsqrt(var + eps)
    bias = beta.astype(jnp.float32) - mean * scale

    if epilogue_tile is None:
        epilogue_tile = _pick_pixel_tile(HW, N, cap=8192, min_steps=2)
    assert HW % epilogue_tile == 0
    n_e = HW // epilogue_tile

    # ---- Pallas kernel 2: fused BN-affine + ReLU over fat lane-dense tiles ----
    bn_call = pl.pallas_call(
        _bn_relu_kernel,
        grid_spec=pltpu.PrefetchScalarGridSpec(
            num_scalar_prefetch=0,
            grid=(N, n_e),
            in_specs=[
                pl.BlockSpec((1, Cout, epilogue_tile), lambda n, t: (n, 0, t)),
                pl.BlockSpec((Cout, 1), lambda n, t: (0, 0)),
                pl.BlockSpec((Cout, 1), lambda n, t: (0, 0)),
            ],
            out_specs=pl.BlockSpec((1, Cout, epilogue_tile), lambda n, t: (n, 0, t)),
        ),
        out_shape=jax.ShapeDtypeStruct((N, Cout, HW), jnp.float32),
        compiler_params=pltpu.CompilerParams(
            dimension_semantics=("parallel", "parallel"),
            vmem_limit_bytes=48 * 1024 * 1024),
    )
    out_flat = bn_call(conv_out, scale.reshape(Cout, 1), bias.reshape(Cout, 1))

    # (N, Cout, H*W) is already NCHW-flat: reshape is free (no transpose pass).
    return out_flat.reshape(N, Cout, H, W)


def _reference(x_nchw, weight_oihw, gamma, beta, *, dilation=1, eps=1e-5):
    """Pure-JAX reference mirroring the kernel's mixed precision: bf16 conv operands,
    f32 conv / BN-statistic math, bf16-rounded conv intermediate before the affine."""
    x = x_nchw.astype(jnp.bfloat16).astype(jnp.float32)
    w = weight_oihw.astype(jnp.bfloat16).astype(jnp.float32)
    y = lax.conv_general_dilated(
        x, w, window_strides=(1, 1),
        padding=[(dilation, dilation), (dilation, dilation)],
        rhs_dilation=(dilation, dilation),
        dimension_numbers=("NCHW", "OIHW", "NCHW"))
    mean = jnp.mean(y, axis=(0, 2, 3), keepdims=True)
    var = jnp.mean((y - mean) ** 2, axis=(0, 2, 3), keepdims=True)   # biased (train-mode BN)
    y16 = y.astype(jnp.bfloat16).astype(jnp.float32)                 # bf16 conv intermediate
    yn = (y16 - mean) * lax.rsqrt(var + eps)
    yn = yn * gamma.reshape(1, -1, 1, 1) + beta.reshape(1, -1, 1, 1)
    return jnp.maximum(yn, 0.0)


if __name__ == "__main__":
    # Small shapes consistent with the module: batch=2, inplanes=4, planes=8, 16x16.
    N, Cin, Cout, H, W = 2, 4, 8, 16, 16
    dilation = 1

    key = jax.random.PRNGKey(0)
    kx, kw = jax.random.split(key)
    x = jax.random.normal(kx, (N, Cin, H, W), dtype=jnp.float32)
    weight = 0.1 * jax.random.normal(kw, (Cout, Cin, 3, 3), dtype=jnp.float32)
    gamma = jnp.ones((Cout,), jnp.float32)
    beta = jnp.zeros((Cout,), jnp.float32)

    run = jax.jit(functools.partial(conv_bnr, dilation=dilation))
    out = jax.block_until_ready(run(x, weight, gamma, beta))

    ref = _reference(x, weight, gamma, beta, dilation=dilation)
    assert out.shape == (N, Cout, H, W)
    max_err = float(jnp.max(jnp.abs(out - ref)))
    assert jnp.allclose(out, ref, atol=2e-3, rtol=2e-3), \
        f"mismatch vs reference, max|err|={max_err}"

    print("KERNEL_OK")
</pallas_src>

<mosaic_0001>
module attributes {stable_mosaic.version = 11 : i64} {
  func.func @_conv_kernel(%arg0: i32, %arg1: i32, %arg2: memref<1x36x128xbf16, #tpu.memory_space<vmem>>, %arg3: memref<8x36xbf16, #tpu.memory_space<vmem>>, %arg4: memref<1x8x128xbf16, #tpu.memory_space<vmem>>, %arg5: memref<1x1x8x2xf32, #tpu.memory_space<vmem>>) attributes {dimension_semantics = [#tpu.dimension_semantics<parallel>, #tpu.dimension_semantics<parallel>], iteration_bounds = array<i64: 2, 2>, scalar_prefetch = 0 : i64, scratch_operands = 0 : i64, tpu.core_type = #tpu.core_type<tc>, window_params = [{transform_indices = @transform_0, window_bounds = array<i64: 1, 36, 128>}, {pipeline_mode = #tpu.pipeline_mode<synchronous>, transform_indices = @transform_1, window_bounds = array<i64: 8, 36>}, {transform_indices = @transform_2, window_bounds = array<i64: 1, 8, 128>}, {transform_indices = @transform_3, window_bounds = array<i64: 1, 1, 8, 2>}]} {
    %c0 = arith.constant 0 : index
    %c0_0 = arith.constant 0 : index
    %0 = vector.load %arg3[%c0, %c0_0] : memref<8x36xbf16, #tpu.memory_space<vmem>>, vector<8x36xbf16>
    %c0_1 = arith.constant 0 : index
    %c0_2 = arith.constant 0 : index
    %c0_3 = arith.constant 0 : index
    %1 = vector.load %arg2[%c0_1, %c0_2, %c0_3] : memref<1x36x128xbf16, #tpu.memory_space<vmem>>, vector<1x36x128xbf16>
    %2 = vector.shape_cast %1 : vector<1x36x128xbf16> to vector<36x128xbf16>
    %cst = arith.constant dense<0.000000e+00> : vector<8x128xf32>
    %3 = tpu.matmul %0, %2, %cst {dimension_numbers = #tpu.dot_dimension_numbers<[1], [0], [0], [1], [0, 0, 1, 1], [], []>} : vector<8x36xbf16>, vector<36x128xbf16>, vector<8x128xf32> -> vector<8x128xf32>
    %4 = arith.truncf %3 : vector<8x128xf32> to vector<8x128xbf16>
    %c0_4 = arith.constant 0 : index
    %c0_5 = arith.constant 0 : index
    %c0_6 = arith.constant 0 : index
    %5 = vector.load %arg4[%c0_4, %c0_5, %c0_6] : memref<1x8x128xbf16, #tpu.memory_space<vmem>>, vector<1x8x128xbf16>
    %6 = vector.shape_cast %5 : vector<1x8x128xbf16> to vector<8x128xbf16>
    %7 = vector.shape_cast %4 : vector<8x128xbf16> to vector<1x8x128xbf16>
    tpu.vector_store %arg4[%c0_4, %c0_5, %c0_6], %7 {strides = array<i32>} : memref<1x8x128xbf16, #tpu.memory_space<vmem>>, vector<1x8x128xbf16>,
    %cst_7 = arith.constant dense<0.000000e+00> : vector<8xf32>
    %8 = vector.multi_reduction <add>, %3, %cst_7 [1] : vector<8x128xf32> to vector<8xf32>
    %9 = vector.shape_cast %8 : vector<8xf32> to vector<8x1xf32>
    %10 = arith.mulf %3, %3 : vector<8x128xf32>
    %cst_8 = arith.constant dense<0.000000e+00> : vector<8xf32>
    %11 = vector.multi_reduction <add>, %10, %cst_8 [1] : vector<8x128xf32> to vector<8xf32>
    %12 = vector.shape_cast %11 : vector<8xf32> to vector<8x1xf32>
    %13 = tpu.concatenate %9, %12 in 1 : vector<8x1xf32>, vector<8x1xf32> -> vector<8x2xf32>
    %c0_9 = arith.constant 0 : index
    %c0_10 = arith.constant 0 : index
    %c0_11 = arith.constant 0 : index
    %c0_12 = arith.constant 0 : index
    %14 = vector.load %arg5[%c0_9, %c0_10, %c0_11, %c0_12] : memref<1x1x8x2xf32, #tpu.memory_space<vmem>>, vector<1x1x8x2xf32>
    %15 = vector.shape_cast %14 : vector<1x1x8x2xf32> to vector<8x2xf32>
    %16 = vector.shape_cast %13 : vector<8x2xf32> to vector<1x1x8x2xf32>
    tpu.vector_store %arg5[%c0_9, %c0_10, %c0_11, %c0_12], %16 {strides = array<i32>} : memref<1x1x8x2xf32, #tpu.memory_space<vmem>>, vector<1x1x8x2xf32>,
    return
  }
  func.func @transform_0(%arg0: i32, %arg1: i32) -> (i32, i32, i32) {
    %c0_i32 = arith.constant 0 : i32
    %c0_i32_0 = arith.constant 0 : i32
    return %arg0, %c0_i32, %arg1 : i32, i32, i32
  }
  func.func @transform_1(%arg0: i32, %arg1: i32) -> (i32, i32) {
    %c0_i32 = arith.constant 0 : i32
    %c0_i32_0 = arith.constant 0 : i32
    %c0_i32_1 = arith.constant 0 : i32
    return %c0_i32, %c0_i32_0 : i32, i32
  }
  func.func @transform_2(%arg0: i32, %arg1: i32) -> (i32, i32, i32) {
    %c0_i32 = arith.constant 0 : i32
    %c0_i32_0 = arith.constant 0 : i32
    return %arg0, %c0_i32, %arg1 : i32, i32, i32
  }
  func.func @transform_3(%arg0: i32, %arg1: i32) -> (i32, i32, i32, i32) {
    %c0_i32 = arith.constant 0 : i32
    %c0_i32_0 = arith.constant 0 : i32
    %c0_i32_1 = arith.constant 0 : i32
    return %arg0, %arg1, %c0_i32, %c0_i32_0 : i32, i32, i32, i32
  }
}

module attributes {stable_mosaic.version = 11 : i64} {
  func.func @_bn_relu_kernel(%arg0: i32, %arg1: i32, %arg2: memref<1x8x256xbf16, #tpu.memory_space<vmem>>, %arg3: memref<8x1xf32, #tpu.memory_space<vmem>>, %arg4: memref<8x1xf32, #tpu.memory_space<vmem>>, %arg5: memref<1x8x256xf32, #tpu.memory_space<vmem>>) attributes {dimension_semantics = [#tpu.dimension_semantics<parallel>, #tpu.dimension_semantics<parallel>], iteration_bounds = array<i64: 2, 1>, scalar_prefetch = 0 : i64, scratch_operands = 0 : i64, tpu.core_type = #tpu.core_type<tc>, window_params = [{transform_indices = @transform_0, window_bounds = array<i64: 1, 8, 256>}, {pipeline_mode = #tpu.pipeline_mode<synchronous>, transform_indices = @transform_1, window_bounds = array<i64: 8, 1>}, {pipeline_mode = #tpu.pipeline_mode<synchronous>, transform_indices = @transform_2, window_bounds = array<i64: 8, 1>}, {transform_indices = @transform_3, window_bounds = array<i64: 1, 8, 256>}]} {
    %c0 = arith.constant 0 : index
    %c0_0 = arith.constant 0 : index
    %c0_1 = arith.constant 0 : index
    %0 = vector.load %arg2[%c0, %c0_0, %c0_1] : memref<1x8x256xbf16, #tpu.memory_space<vmem>>, vector<1x8x256xbf16>
    %1 = vector.shape_cast %0 : vector<1x8x256xbf16> to vector<8x256xbf16>
    %2 = arith.extf %1 : vector<8x256xbf16> to vector<8x256xf32>
    %c0_2 = arith.constant 0 : index
    %c0_3 = arith.constant 0 : index
    %3 = vector.load %arg3[%c0_2, %c0_3] : memref<8x1xf32, #tpu.memory_space<vmem>>, vector<8x1xf32>
    %4 = vector.broadcast %3 : vector<8x1xf32> to vector<8x256xf32>
    %5 = arith.mulf %2, %4 : vector<8x256xf32>
    %c0_4 = arith.constant 0 : index
    %c0_5 = arith.constant 0 : index
    %6 = vector.load %arg4[%c0_4, %c0_5] : memref<8x1xf32, #tpu.memory_space<vmem>>, vector<8x1xf32>
    %7 = vector.broadcast %6 : vector<8x1xf32> to vector<8x256xf32>
    %8 = arith.addf %5, %7 : vector<8x256xf32>
    %cst = arith.constant 0.000000e+00 : f32
    %9 = vector.broadcast %cst : f32 to vector<8x256xf32>
    %10 = arith.maximumf %8, %9 : vector<8x256xf32>
    %c0_6 = arith.constant 0 : index
    %c0_7 = arith.constant 0 : index
    %c0_8 = arith.constant 0 : index
    %11 = vector.load %arg5[%c0_6, %c0_7, %c0_8] : memref<1x8x256xf32, #tpu.memory_space<vmem>>, vector<1x8x256xf32>
    %12 = vector.shape_cast %11 : vector<1x8x256xf32> to vector<8x256xf32>
    %13 = vector.shape_cast %10 : vector<8x256xf32> to vector<1x8x256xf32>
    tpu.vector_store %arg5[%c0_6, %c0_7, %c0_8], %13 {strides = array<i32>} : memref<1x8x256xf32, #tpu.memory_space<vmem>>, vector<1x8x256xf32>,
    return
  }
  func.func @transform_0(%arg0: i32, %arg1: i32) -> (i32, i32, i32) {
    %c0_i32 = arith.constant 0 : i32
    %c0_i32_0 = arith.constant 0 : i32
    return %arg0, %c0_i32, %arg1 : i32, i32, i32
  }
  func.func @transform_1(%arg0: i32, %arg1: i32) -> (i32, i32) {
    %c0_i32 = arith.constant 0 : i32
    %c0_i32_0 = arith.constant 0 : i32
    %c0_i32_1 = arith.constant 0 : i32
    return %c0_i32, %c0_i32_0 : i32, i32
  }
  func.func @transform_2(%arg0: i32, %arg1: i32) -> (i32, i32) {
    %c0_i32 = arith.constant 0 : i32
    %c0_i32_0 = arith.constant 0 : i32
    %c0_i32_1 = arith.constant 0 : i32
    return %c0_i32, %c0_i32_0 : i32, i32
  }
  func.func @transform_3(%arg0: i32, %arg1: i32) -> (i32, i32, i32) {
    %c0_i32 = arith.constant 0 : i32
    %c0_i32_0 = arith.constant 0 : i32
    return %arg0, %c0_i32, %arg1 : i32, i32, i32
  }
}

</mosaic_0001>

<bundles_post_ra>
// kernel: conv_bnr.2
= control target key start
LH: loop header
LB: loop body
LE: loop exit
PB: predicated region body
PF: predicated region fallthrough
CT: control target
= control target key end

     0   :  { %s661_s12 = smov 0   ;;  %s663_s13 = smov 0   ;;  %s758_s0 = inlined_call_operand.vmem [shape: bf16[2,36,256], index: 0, kind: input, shape index: {}]   ;;  %s759_s1 = inlined_call_operand.vmem [shape: bf16[8,36], index: 1, kind: input, shape index: {}]   ;;  %s760_s2 = inlined_call_operand.vmem [shape: bf16[2,8,256], index: 2, kind: output, shape index: {0}]   ;;  %s761_s3 = inlined_call_operand.vmem [shape: f32[2,2,8,2], index: 3, kind: output, shape index: {1}]  }
   0x1   :  { %s665_s14 = smov 0   ;;  %s667_s15 = smov 0  }
   0x2   :  { %s669_s16 = smov 0   ;;  %s671_s17 = smov 0  }
   0x3   :  { %s673_s18 = smov 0  }
   0x4 LB: > { %s23_s19 = sadd.s32 1, %s629_s16  ;;  %s26_s20 = sadd.s32 1, %s633_s17  ;;  %s637_s18 = sphi %s673_s18, %s14_s18   ;;  %s633_s17 = sphi %s671_s17, %s767_s17   ;;  %s629_s16 = sphi %s669_s16, %s766_s16   ;;  %s625_s15 = sphi %s667_s15, %s765_s15   ;;  %s621_s14 = sphi %s665_s14, %s764_s14   ;;  %s617_s13 = sphi %s663_s13, %s763_s13   ;;  %s613_s12 = sphi %s661_s12, %s762_s12  }
   0x5   : > { %p24_p0 = scmp.ge.s32.totalorder %s23_s19, 2  ;;  %p42_p1 = scmp.ne.s32.totalorder %s617_s13, %s613_s12 }
   0x6   : > { %p43_p2 = scmp.eq.s32.totalorder %s637_s18, 0  ;;  %s35_s24 = sadd.s32 1, %s617_s13 }
   0x7   : > { %s769_s19 = smov (%p24_p0, %s23_s19), 0  ;;  %s771_s20 = smov (!%p24_p0, %s26_s20), %s633_s17 }
   0x8   : > { %p44_p3 = por %p43_p2, %p42_p1  ;;  %p28_p4 = scmp.ge.s32.totalorder %s771_s20, 2 }
   0x9   : > { %s31_s21 = ssub.s32 %s629_s16, %s769_s19  ;;  %p492_p6 = scmp.ge.s32.totalorder %s637_s18, 4 }
   0xa   : > { %s773_s20 = smov (%p28_p4, %s771_s20), 0 }
   0xb   : > { %s30_s22 = ssub.s32 %s633_s17, %s773_s20  ;;  %148 = sbr.rel (%p492_p6) target bundleno = 28 (0x1c), region = 20 }
   0xc   : > { %s32_s23 = sor.u32 %s31_s21, %s30_s22 }
   0xd   : > { %p33_p5 = scmp.eq.s32.totalorder %s32_s23, 0 }
   0xf   : > { %s712_s25 = scalar_select %p33_p5, %s617_s13, %s35_s24  }
  0x12   : > { %151 = sbr.rel (!%p44_p3) target bundleno = 28 (0x1c), region = 24  ;;  %s153_s26 = sand.u32 (%p44_p3), 1, %s617_s13  }
  0x13   : > { %s520_s27 = smul.u32 (%p44_p3), 10, %s633_s17 }
  0x14   : > { %s519_s28 = smul.u32 (%p44_p3), 20, %s153_s26 }
  0x15   : > { %s157_s29 = sadd.s32 (%p44_p3), %s629_s16, %s520_s27 }
  0x16   : > { %s493_s30 = sshll.u32 (%p44_p3), %s157_s29, 2  ;;  %s155_s7 = scalar_lea.vmem (%p44_p3), [#allocation2], %s519_s28 }
  0x17   : > { %s159_s6 = scalar_lea.vmem (%p44_p3), %s758_s0, %s493_s30 }
  0x18   : > { %v175_v0 = vld [vmem:[%s159_s6] sm:$0xf] (%p44_p3)  ;;  %v177_v1 = vld [vmem:[%s159_s6 + $0x8] sm:$0xf] (%p44_p3)  ;;  %v179_v2 = vld [vmem:[%s159_s6 + $0x10] sm:$0xf] (%p44_p3) }
  0x19   : > { %176 = vst [vmem:[%s155_s7] sm:$0xf] %v175_v0  ;;  %178 = vst [vmem:[%s155_s7 + $0x4] sm:$0xf] %v177_v1  ;;  %v181_v3 = vld [vmem:[%s159_s6 + $0x18] sm:$0xf] }
  0x1a   : > { %180 = vst [vmem:[%s155_s7 + $0x8] sm:$0xf] %v179_v2  ;;  %v183_v4 = vld [vmem:[%s159_s6 + $0x20] sm:$0xf]  ;;  %182 = vst [vmem:[%s155_s7 + $0xc] sm:$0xf] %v181_v3 }
  0x1b   : > { %184 = vst [vmem:[%s155_s7 + $0x10] sm:$0xf] %v183_v4 }
  0x1c PF: > { %p494_p7 = scmp.ge.s32.totalorder %s637_s18, 1  ;;  %p216_p8 = scmp.lt.s32.totalorder %s637_s18, 5 }
  0x1e   : > { %p217_p9 = pnand %p494_p7, %p216_p8 }
  0x1f   : > { %s223_s8 = sand.u32 (!%p217_p9), 1, %s613_s12   ;;  %v639_v5 = vmov (!%p217_p9), 0.0   ;;  %vm640_vm0 = vmmov (!%p217_p9), 0   ;;  %vm299_vm1 = vcmask (!%p217_p9), 1041408   ;;  %v274_v10 = vld [vmem:[%s759_s1] sm:$0xf] (!%p217_p9) }
  0x20   : > { %220 = sbr.rel (%p217_p9) target bundleno = 408 (0x198), region = 65  ;;  %509 = vmatprep.subr.bf16.mxu0 (!%p217_p9), %v639_v5  ;;  %515 = vmatprep.mubr.msk.bf16.mxu0 (!%p217_p9), %vm640_vm0, %v639_v5  ;;  %vm295_vm2 = vcmask (!%p217_p9), 293888   ;;  %p257_p10 = scmp.lt.s32.totalorder (!%p217_p9), %s625_s15, 1  ;;  %vm350_vm3 = vcmask (!%p217_p9), 7168   ;;  %vm352_vm4 = vcmask (!%p217_p9), 15360  }
  0x21   : > { %s521_s9 = smul.u32 (!%p217_p9), 20, %s223_s8  ;;  %p259_p11 = scmp.lt.s32.totalorder (!%p217_p9), %s621_s14, 1 }
  0x23   : > { %s225_s10 = scalar_lea.vmem (!%p217_p9), [#allocation2], %s521_s9 }
  0x24   : > { %v580_v6 = vld [vmem:[%s225_s10] sm:$0xff] (!%p217_p9)   ;;  %v581_v7 = vld [vmem:[%s225_s10 + $0x8] sm:$0xff] (!%p217_p9)   ;;  %v582_v8 = vld [vmem:[%s225_s10 + $0x10] ss:$0 sps:$4 sm:$0x33] (!%p217_p9)  }
  0x25   : > { %510 = vmatpush3.bf16.msra.mxu0 (!%p217_p9), %v580_v6  ;;  %v301_v9 = vsel (!%p217_p9), %vm299_vm1, %v582_v8, 0 }
  0x26   : > { %511 = vmatprep.subr.bf16.mxu0 (!%p217_p9), %v639_v5 }
  0x27   : > { %s775_s15 = smov (!%p257_p10, %s625_s15), 1  ;;  %s777_s14 = smov (!%p259_p11, %s621_s14), 1 }
  0x28   : > { %s495_s21 = sshll.u32 %s775_s15, 1 }
  0x29   : > { %512 = vmatpush3.bf16.msra.mxu0 %v581_v7  ;;  %s262_s22 = sadd.s32 %s495_s21, %s777_s14 }
  0x2a   : > { %513 = vmatprep.subr.bf16.mxu0 %v639_v5  ;;  %s496_s23 = sshll.u32 %s262_s22, 2  ;;  %s498_s28 = sshll.u32 %s262_s22, 3 }
  0x2b   : > { %s264_s27 = scalar_lea.vmem %s760_s2, %s496_s23  ;;  %s272_s14 = scalar_lea.vmem %s761_s3, %s498_s28 }
  0x2d   : > { %514 = vmatpush3.bf16.msra.mxu0 %v301_v9 }
  0x30   : > { %516 = vmatmul.mubr.msk.bf16.vlgmr.msra.gmra.mrb[0].mxu0 %vm295_vm2, %v274_v10 }
 0x103   : > { %v337_v11 = vpop.f32.mrb[0].mxu0 }
 0x104   : > { %v343_v12 = vpack.c.bf16 %v337_v11, %v337_v11  ;;  %345 = vadd.xlane.f32.xlu0 %v337_v11  ;;  %v517_v13 = vpop.f32.mrb[1].mxu0  ;;  %v347_v16 = vmul.f32 %v337_v11, %v337_v11 }
 0x105   : > { %v340_v14 = vpop.f32.mrb[2].mxu0 }
 0x106   : > { %344 = vst [vmem:[%s264_s27] sm:$0xf] %v343_v12  ;;  %v518_v15 = vpop.f32.mrb[3].mxu0 }
 0x108   : > { %348 = vadd.xlane.f32.xlu0 %v347_v16 }
 0x191   : > { %v346_v17 = vpop.xlane.xlu0 %345 }
 0x195   : > { %v349_v18 = vpop.xlane.xlu0 %348 }
 0x196   : > { %v351_v19 = vsel %vm350_vm3, %v346_v17, %v349_v18 }
 0x197   : > { %353 = vst.msk [vmem:[%s272_s14] sm:$0xff] %vm352_vm4, %v351_v19 }
 0x198 PF: > { %s14_s18 = sadd.s32 1, %s637_s18   ;;  %s762_s12 = smov %s617_s13 }
 0x199   : > { %p11_p12 = scmp.ge.s32.totalorder %s14_s18, 6   ;;  %s763_s13 = smov %s712_s25 }
 0x19a   : > { %s764_s14 = smov %s629_s16  ;;  %s765_s15 = smov %s633_s17 }
 0x19b   : > { %s766_s16 = smov %s769_s19  ;;  %s767_s17 = smov %s773_s20 }
 0x19c   :  { %13 = sbr.rel (!%p11_p12) target bundleno = 4 (0x4), region = 116 }

// kernel: conv_bnr.3
= control target key start
LH: loop header
LB: loop body
LE: loop exit
PB: predicated region body
PF: predicated region fallthrough
CT: control target
= control target key end

     0   :  { %s404_s12 = smov 0   ;;  %s406_s13 = smov 0   ;;  %s443_s0 = inlined_call_operand.vmem [shape: bf16[2,8,256], index: 0, kind: input, shape index: {}]   ;;  %s444_s1 = inlined_call_operand.vmem [shape: f32[8,1], index: 1, kind: input, shape index: {}]   ;;  %s445_s2 = inlined_call_operand.vmem [shape: f32[8,1], index: 2, kind: input, shape index: {}]   ;;  %s446_s3 = inlined_call_operand.vmem [shape: f32[2,8,256], index: 3, kind: output, shape index: {}]  }
   0x1   :  { %s408_s14 = smov 0  }
   0x2 LB: > { %s25_s15 = sadd.s32 1, %s377_s13  ;;  %p324_p0 = scmp.ge.s32.totalorder %s381_s14, 1  ;;  %s381_s14 = sphi %s408_s14, %s13_s14   ;;  %s377_s13 = sphi %s406_s13, %s448_s13   ;;  %s373_s12 = sphi %s404_s12, %s447_s12  }
   0x3   : > { %p27_p1 = scmp.ge.s32.totalorder %s25_s15, 2  ;;  %p158_p2 = scmp.lt.s32.totalorder %s381_s14, 3 }
   0x5   : > { %s450_s15 = smov (%p27_p1, %s25_s15), 0  ;;  %p159_p3 = pnand %p324_p0, %p158_p2 }
   0x6   : > { %v213_v0 = vld [vmem:[%s444_s1] sm:$0xff] (!%p159_p3)  ;;  %v383_v1 = vmov (!%p159_p3), 0   ;;  %p191_p4 = scmp.lt.s32.totalorder (!%p159_p3), %s373_s12, 1 }
   0x7   : > { %162 = sbr.rel (%p159_p3) target bundleno = 145 (0x91), region = 32  ;;  %358 = vset.pattern.permute.xlu0 (!%p159_p3), %v383_v1  ;;  %v221_v2 = vld [vmem:[%s445_s2] sm:$0xff] (!%p159_p3) }
   0x8   : > { %216 = vperm.xlu0 (!%p159_p3), %358, %v213_v0  }
   0xc   : > { %224 = vperm.xlu0 (!%p159_p3), %358, %v221_v2  }
   0xe   : > { %s452_s12 = smov (!%p191_p4, %s373_s12), 1 }
   0xf   : > { %s331_s20 = sshll.u32 %s452_s12, 3  ;;  %s332_s24 = sshll.u32 %s452_s12, 4 }
  0x10   : > { %s198_s23 = scalar_lea.vmem %s443_s0, %s331_s20  ;;  %s208_s27 = scalar_lea.vmem %s446_s3, %s332_s24 }
  0x11   : > { %v210_v3 = vld [vmem:[%s198_s23] sm:$0xff] }
  0x12   : > { %v211_v4 = vunpack.c.l.bf16 %v210_v3  ;;  %v212_v5 = vunpack.c.h.bf16 %v210_v3 }
  0x87   : > { %v217_v6 = vpop.permute.xlu0 %216 }
  0x88   : > { %v219_v7 = vmul.f32 %v217_v6, %v211_v4  ;;  %v220_v8 = vmul.f32 %v217_v6, %v212_v5 }
  0x8b   : > { %v225_v9 = vpop.permute.xlu0 %224 }
  0x8c   : > { %v227_v10 = vadd.f32 %v225_v9, %v219_v7  ;;  %v228_v11 = vadd.f32 %v225_v9, %v220_v8 }
  0x8e   : > { %v229_v12 = vmax.f32 %v227_v10, 0.0  ;;  %v230_v13 = vmax.f32 %v228_v11, 0.0 }
  0x90   : > { %231 = vst [vmem:[%s208_s27] sm:$0xff] %v229_v12  ;;  %232 = vst [vmem:[%s208_s27 + $0x8] sm:$0xff] %v230_v13 }
  0x91 PF: > { %s13_s14 = sadd.s32 1, %s381_s14   ;;  %s447_s12 = smov %s377_s13 }
  0x92   : > { %p10_p5 = scmp.ge.s32.totalorder %s13_s14, 4   ;;  %s448_s13 = smov %s450_s15 }
  0x94   :  { %12 = sbr.rel (!%p10_p5) target bundleno = 2 (0x2), region = 62 }

</bundles_post_ra>
